<compile_context>
chip_gen: v7x
topology: tpu7x:2x2x1
jax: 0.10.0
libtpu: 0.0.40
codegen_flags: <defaults>
</compile_context>

<pallas_src>
import functools
import math

import jax
import jax.numpy as jnp
from jax.experimental import pallas as pl
from jax.experimental.pallas import tpu as pltpu

OBS_DIM = 6
ACTION_DIM = 13
ID_DIM = 5
E_DIM = OBS_DIM + ACTION_DIM + ID_DIM        # 24
ENC_IN = 3 + 3 + ACTION_DIM                  # 19  = [obs_drag | obs_self | actions]
ENC_OUT = 16 + 16 + 32                       # 64  = [dragon_feat | self_feat | actions_feat]
XI_ROWS = ENC_IN + ID_DIM                    # 24  = xenc + ids rows of the input slab
H_OFF = 32                                   # hidden state starts at sublane 32 (16-aligned, bf16)

RNN_HIDDEN = 32                              # args.rnn_hidden_dim
FC2_HIDDEN = 32
N_ACTIONS = 13                               # args.n_actions


def _gelu_exact(x):
    # nn.GELU() default (approximate='none'): 0.5 * x * (1 + erf(x / sqrt(2)))
    return 0.5 * x * (1.0 + jax.lax.erf(x * (1.0 / math.sqrt(2.0))))


def nrnn_kernel(x_ref, wa_ref, wb_ref, w2a_ref, w2b_ref, bias_ref,
                q_ref, hh_ref, *, hidden):
    """Transposed layout: features on sublanes, rows (batch*agents) on lanes."""
    H = hidden
    EO = ENC_OUT

    x = x_ref[...]                                    # (H_OFF+H, T) bf16
    bias = bias_ref[...]                              # (EO+4H+32+A, 1) f32

    # M1: block-diagonal slab over [xenc | ids | pad | h]:
    #   rows 0:EO          encoder pre-activations
    #   rows EO+0H:EO+1H   ids->r   + Whh_r @ h
    #   rows EO+1H:EO+2H   ids->z   + Whh_z @ h
    #   rows EO+2H:EO+3H   ids->n   (input half of the n gate)
    #   rows EO+3H:EO+4H   Whh_n @ h (hidden half of the n gate)
    pre = jnp.dot(wa_ref[...], x, preferred_element_type=jnp.float32)   # (EO+4H, T)

    enc = jax.nn.relu(pre[0:EO] + bias[0:EO])                           # (EO, T) f32

    # M2: relu(enc) -> (r, z, n_in) contributions of the fc1-folded GRU ih matmul.
    gi = jnp.dot(wb_ref[...], enc.astype(jnp.bfloat16),
                 preferred_element_type=jnp.float32)                    # (3H, T)

    # GRUCell (PyTorch gate order r, z, n); all sublane slices are 32-aligned.
    r = jax.nn.sigmoid(pre[EO:EO + H] + gi[0:H] + bias[EO:EO + H])
    z = jax.nn.sigmoid(pre[EO + H:EO + 2 * H] + gi[H:2 * H]
                       + bias[EO + H:EO + 2 * H])
    h_n = pre[EO + 3 * H:EO + 4 * H] + bias[EO + 3 * H:EO + 4 * H]      # Whh_n h + b_hn
    n = jnp.tanh(pre[EO + 2 * H:EO + 3 * H] + gi[2 * H:3 * H]
                 + bias[EO + 2 * H:EO + 3 * H] + r * h_n)
    h = x[H_OFF:H_OFF + H].astype(jnp.float32)
    hh = (1.0 - z) * n + z * h                                          # (H, T) f32
    hh_ref[...] = hh.astype(hh_ref.dtype)

    # fc2: Linear -> exact GELU -> Linear
    b2a = bias[EO + 4 * H:EO + 4 * H + FC2_HIDDEN]
    b2b = bias[EO + 4 * H + FC2_HIDDEN:]
    y = _gelu_exact(jnp.dot(w2a_ref[...], hh.astype(jnp.bfloat16),
                            preferred_element_type=jnp.float32) + b2a)  # (32, T)
    q = jnp.dot(w2b_ref[...], y.astype(jnp.bfloat16),
                preferred_element_type=jnp.float32) + b2b               # (A, T)
    q_ref[...] = q.astype(q_ref.dtype)


def init_params(key, hidden=RNN_HIDDEN, n_actions=N_ACTIONS):
    """PyTorch-layout params (weights are (out, in)), PyTorch-default uniform init."""
    def lin(k, fan_in, fan_out):
        bound = 1.0 / math.sqrt(fan_in)
        k1, k2 = jax.random.split(k)
        w = jax.random.uniform(k1, (fan_out, fan_in), jnp.float32, -bound, bound)
        b = jax.random.uniform(k2, (fan_out,), jnp.float32, -bound, bound)
        return w, b

    keys = jax.random.split(key, 8)
    wd, bd = lin(keys[0], 3, 16)              # dragon_encoder
    ws, bs = lin(keys[1], 3, 16)              # self_encoder
    wa, ba = lin(keys[2], 13, 32)             # action_encoder
    w1, b1 = lin(keys[3], 16 + 16 + 32 + 5, hidden)
    kb = 1.0 / math.sqrt(hidden)
    k4a, k4b = jax.random.split(keys[4])
    wih = jax.random.uniform(k4a, (3 * hidden, hidden), jnp.float32, -kb, kb)
    bih = jax.random.uniform(k4b, (3 * hidden,), jnp.float32, -kb, kb)
    k5a, k5b = jax.random.split(keys[5])
    whh = jax.random.uniform(k5a, (3 * hidden, hidden), jnp.float32, -kb, kb)
    bhh = jax.random.uniform(k5b, (3 * hidden,), jnp.float32, -kb, kb)
    w2a, b2a = lin(keys[6], hidden, 32)
    w2b, b2b = lin(keys[7], 32, n_actions)
    return dict(wd=wd, bd=bd, ws=ws, bs=bs, wa=wa, ba=ba, w1=w1, b1=b1,
                wih=wih, bih=bih, whh=whh, bhh=bhh,
                w2a=w2a, b2a=b2a, w2b=w2b, b2b=b2b)


def prep_kernel_params(p, hidden=RNN_HIDDEN):
    """One-time wrapper-side weight packing: fc1 folded into GRU ih, encoder +
    GRU weights stacked into two slabs, biases packed into one f32 column."""
    H = hidden
    f32 = jnp.float32
    hi = jax.lax.Precision.HIGHEST

    # Block-diagonal fused encoder (64, 19): [dragon | self | action].
    wenc = jnp.zeros((ENC_OUT, ENC_IN), f32)
    wenc = wenc.at[0:16, 0:3].set(p["wd"])
    wenc = wenc.at[16:32, 3:6].set(p["ws"])
    wenc = wenc.at[32:64, 6:19].set(p["wa"])
    benc = jnp.concatenate([p["bd"], p["bs"], p["ba"]])                  # (64,)

    # fc1 fold: gi = Wih (W1 c + b1) + bih = (Wih @ W1) c + (Wih @ b1 + bih)
    wih_f = jnp.dot(p["wih"], p["w1"], precision=hi)                     # (3H, 69)
    bih_f = jnp.dot(p["wih"], p["b1"], precision=hi) + p["bih"]          # (3H,)
    whh, bhh = p["whh"], p["bhh"]

    wr, wz, wn = wih_f[0:H], wih_f[H:2 * H], wih_f[2 * H:3 * H]          # (H, 69) each
    whr, whz, whn = whh[0:H], whh[H:2 * H], whh[2 * H:3 * H]

    # Big slab W_a (ENC_OUT + 4H, H_OFF + H) applied to
    # [xenc(0:19) | ids(19:24) | pad(24:32) | h(32:32+H)].
    wa_slab = jnp.zeros((ENC_OUT + 4 * H, H_OFF + H), f32)
    wa_slab = wa_slab.at[0:ENC_OUT, 0:ENC_IN].set(wenc)
    i0, i1 = ENC_IN, ENC_IN + ID_DIM
    h0, h1 = H_OFF, H_OFF + H
    r0 = ENC_OUT
    wa_slab = wa_slab.at[r0 + 0 * H:r0 + 1 * H, i0:i1].set(wr[:, ENC_OUT:])
    wa_slab = wa_slab.at[r0 + 0 * H:r0 + 1 * H, h0:h1].set(whr)
    wa_slab = wa_slab.at[r0 + 1 * H:r0 + 2 * H, i0:i1].set(wz[:, ENC_OUT:])
    wa_slab = wa_slab.at[r0 + 1 * H:r0 + 2 * H, h0:h1].set(whz)
    wa_slab = wa_slab.at[r0 + 2 * H:r0 + 3 * H, i0:i1].set(wn[:, ENC_OUT:])
    wa_slab = wa_slab.at[r0 + 3 * H:r0 + 4 * H, h0:h1].set(whn)

    # Second slab W_b (3H, ENC_OUT): relu(enc) -> (r, z, n_in) contributions.
    wb_slab = jnp.concatenate([wr[:, :ENC_OUT], wz[:, :ENC_OUT], wn[:, :ENC_OUT]], axis=0)

    # Packed bias column: [benc | b_r | b_z | b_in | b_hn | b2a | b2b].
    b_r = bih_f[0:H] + bhh[0:H]
    b_z = bih_f[H:2 * H] + bhh[H:2 * H]
    b_in = bih_f[2 * H:3 * H]
    b_hn = bhh[2 * H:3 * H]          # must stay inside r * (Whh_n h + b_hn)
    bias = jnp.concatenate([benc, b_r, b_z, b_in, b_hn, p["b2a"], p["b2b"]]).reshape(-1, 1)

    return dict(wa=wa_slab.astype(jnp.bfloat16), wb=wb_slab.astype(jnp.bfloat16),
                w2a=p["w2a"].astype(jnp.bfloat16), w2b=p["w2b"].astype(jnp.bfloat16),
                bias=bias.astype(f32))


def _round_up(x, m):
    return ((x + m - 1) // m) * m


@functools.partial(jax.jit, static_argnames=("tile_n",))
def nrnn_agent_forward(inputs, hidden_state, kparams, *, tile_n=8192):
    """inputs: (b, a, 24); hidden_state: (b, a, H) or (b*a, H)."""
    b, a, e = inputs.shape
    H = kparams["w2a"].shape[1]
    A = kparams["w2b"].shape[0]
    N = b * a

    # Row tile on the 128-lane axis.  Large tiles amortize the ~0.35us/step
    # overhead; cap so mid/large problems get >= 2 grid steps (both v7x
    # TensorCores do work under dimension_semantics=("parallel",)).
    n128 = _round_up(N, 128)
    tile = min(tile_n, n128)
    if n128 >= 256 and tile >= n128:
        tile = _round_up(n128 // 2, 128)
    tile = max(128, _round_up(tile, 128))
    n_pad = _round_up(N, tile)
    grid = (n_pad // tile,)

    x = inputs.reshape(N, e).astype(jnp.float32)
    h = hidden_state.reshape(N, H).astype(jnp.float32)

    # One fused concat -> pad -> transpose builds the bf16 activation slab:
    #   rows 0:19   [obs_drag | obs_self | actions]  (encoder input, permuted)
    #   rows 19:24  agent ids
    #   rows 24:32  zero pad (keeps h 16-sublane aligned for bf16 packing)
    #   rows 32:32+H hidden state
    stacked = jnp.concatenate(
        [x[:, 3:6], x[:, 0:3], x[:, OBS_DIM:OBS_DIM + ACTION_DIM],
         x[:, E_DIM - ID_DIM:E_DIM],
         jnp.zeros((N, H_OFF - XI_ROWS), jnp.float32), h], axis=1)        # (N, 32+H)
    x_t = jnp.pad(stacked.astype(jnp.bfloat16), ((0, n_pad - N), (0, 0))).T  # (32+H, n_pad)

    wa, wb, w2a, w2b, bias = (kparams[k] for k in ("wa", "wb", "w2a", "w2b", "bias"))

    def w_spec(arr):   # full block, same index every step -> stays resident in VMEM
        return pl.BlockSpec(arr.shape, lambda i: (0, 0))

    flops = 2 * n_pad * (wa.shape[0] * wa.shape[1] + wb.shape[0] * wb.shape[1]
                         + w2a.shape[0] * w2a.shape[1] + w2b.shape[0] * w2b.shape[1])
    bytes_accessed = (x_t.size * 2 + (A + H) * n_pad * 4
                      + 2 * (wa.size + wb.size + w2a.size + w2b.size) + bias.size * 4)

    q_t, hh_t = pl.pallas_call(
        functools.partial(nrnn_kernel, hidden=H),
        grid=grid,
        in_specs=[pl.BlockSpec((H_OFF + H, tile), lambda i: (0, i)),
                  w_spec(wa), w_spec(wb), w_spec(w2a), w_spec(w2b), w_spec(bias)],
        out_specs=(pl.BlockSpec((A, tile), lambda i: (0, i)),
                   pl.BlockSpec((H, tile), lambda i: (0, i))),
        out_shape=(jax.ShapeDtypeStruct((A, n_pad), jnp.float32),
                   jax.ShapeDtypeStruct((H, n_pad), jnp.float32)),
        compiler_params=pltpu.CompilerParams(
            dimension_semantics=("parallel",),
            vmem_limit_bytes=48 * 1024 * 1024),
        cost_estimate=pl.CostEstimate(flops=int(flops),
                                      transcendentals=int(5 * H * n_pad),
                                      bytes_accessed=int(bytes_accessed)),
    )(x_t, wa, wb, w2a, w2b, bias)

    # TODO(synk): for multi-step RNN rollouts, keep hh in this transposed
    # (H, n_pad) layout between steps instead of re-transposing every step.
    q = q_t[:, :N].T.reshape(b, a, A)
    hh = hh_t[:, :N].T.reshape(b, a, H)
    return q, hh


def nrnn_agent_reference(inputs, hidden_state, p, hidden=RNN_HIDDEN):
    """Pure-JAX mirror of the PyTorch forward (natural row-major layout)."""
    b, a, e = inputs.shape
    H = hidden
    x = inputs.reshape(-1, e).astype(jnp.float32)
    h = hidden_state.reshape(-1, H).astype(jnp.float32)
    obs = x[:, :OBS_DIM]
    actions = x[:, OBS_DIM:OBS_DIM + ACTION_DIM]
    ids = x[:, -ID_DIM:]
    dragon = jax.nn.relu(obs[:, 3:6] @ p["wd"].T + p["bd"])
    selff = jax.nn.relu(obs[:, :3] @ p["ws"].T + p["bs"])
    actf = jax.nn.relu(actions @ p["wa"].T + p["ba"])
    combined = jnp.concatenate([dragon, selff, actf, ids], axis=-1) @ p["w1"].T + p["b1"]
    gi = combined @ p["wih"].T + p["bih"]
    gh = h @ p["whh"].T + p["bhh"]
    r = jax.nn.sigmoid(gi[:, :H] + gh[:, :H])
    z = jax.nn.sigmoid(gi[:, H:2 * H] + gh[:, H:2 * H])
    n = jnp.tanh(gi[:, 2 * H:] + r * gh[:, 2 * H:])
    hh = (1.0 - z) * n + z * h
    y = _gelu_exact(hh @ p["w2a"].T + p["b2a"])
    q = y @ p["w2b"].T + p["b2b"]
    return q.reshape(b, a, -1), hh.reshape(b, a, -1)


if __name__ == "__main__":
    key = jax.random.PRNGKey(0)
    kp, kx, kh = jax.random.split(key, 3)

    b, a = 2, 3  # batch, agents -> N = 6 rows
    params = init_params(kp)
    kparams = prep_kernel_params(params)
    inputs = jax.random.normal(kx, (b, a, E_DIM), jnp.float32)
    hidden0 = jax.random.normal(kh, (b, a, RNN_HIDDEN), jnp.float32)

    q, hh = nrnn_agent_forward(inputs, hidden0, kparams)
    q, hh = jax.block_until_ready(q), jax.block_until_ready(hh)

    q_ref, hh_ref = nrnn_agent_reference(inputs, hidden0, params)
    assert q.shape == (b, a, N_ACTIONS) and hh.shape == (b, a, RNN_HIDDEN)
    err_q = float(jnp.max(jnp.abs(q - q_ref)))
    err_h = float(jnp.max(jnp.abs(hh - hh_ref)))
    assert jnp.allclose(q, q_ref, atol=3e-2, rtol=3e-2), err_q
    assert jnp.allclose(hh, hh_ref, atol=3e-2, rtol=3e-2), err_h

    print("KERNEL_OK")
</pallas_src>

<mosaic_0001>
module attributes {stable_mosaic.version = 11 : i64} {
  func.func @nrnn_kernel(%arg0: i32, %arg1: memref<64x128xbf16, #tpu.memory_space<vmem>>, %arg2: memref<192x64xbf16, #tpu.memory_space<vmem>>, %arg3: memref<96x64xbf16, #tpu.memory_space<vmem>>, %arg4: memref<32x32xbf16, #tpu.memory_space<vmem>>, %arg5: memref<13x32xbf16, #tpu.memory_space<vmem>>, %arg6: memref<237x1xf32, #tpu.memory_space<vmem>>, %arg7: memref<13x128xf32, #tpu.memory_space<vmem>>, %arg8: memref<32x128xf32, #tpu.memory_space<vmem>>) attributes {dimension_semantics = [#tpu.dimension_semantics<parallel>], iteration_bounds = array<i64: 1>, scalar_prefetch = 0 : i64, scratch_operands = 0 : i64, tpu.core_type = #tpu.core_type<tc>, window_params = [{transform_indices = @transform_0, window_bounds = array<i64: 64, 128>}, {pipeline_mode = #tpu.pipeline_mode<synchronous>, transform_indices = @transform_1, window_bounds = array<i64: 192, 64>}, {pipeline_mode = #tpu.pipeline_mode<synchronous>, transform_indices = @transform_2, window_bounds = array<i64: 96, 64>}, {pipeline_mode = #tpu.pipeline_mode<synchronous>, transform_indices = @transform_3, window_bounds = array<i64: 32, 32>}, {pipeline_mode = #tpu.pipeline_mode<synchronous>, transform_indices = @transform_4, window_bounds = array<i64: 13, 32>}, {pipeline_mode = #tpu.pipeline_mode<synchronous>, transform_indices = @transform_5, window_bounds = array<i64: 237, 1>}, {transform_indices = @transform_6, window_bounds = array<i64: 13, 128>}, {transform_indices = @transform_7, window_bounds = array<i64: 32, 128>}]} {
    %c0 = arith.constant 0 : index
    %c0_0 = arith.constant 0 : index
    %0 = vector.load %arg1[%c0, %c0_0] : memref<64x128xbf16, #tpu.memory_space<vmem>>, vector<64x128xbf16>
    %c0_1 = arith.constant 0 : index
    %c0_2 = arith.constant 0 : index
    %1 = vector.load %arg6[%c0_1, %c0_2] : memref<237x1xf32, #tpu.memory_space<vmem>>, vector<237x1xf32>
    %c0_3 = arith.constant 0 : index
    %c0_4 = arith.constant 0 : index
    %2 = vector.load %arg2[%c0_3, %c0_4] : memref<192x64xbf16, #tpu.memory_space<vmem>>, vector<192x64xbf16>
    %cst = arith.constant dense<0.000000e+00> : vector<192x128xf32>
    %3 = tpu.matmul %2, %0, %cst {dimension_numbers = #tpu.dot_dimension_numbers<[1], [0], [0], [1], [0, 0, 1, 1], [], []>} : vector<192x64xbf16>, vector<64x128xbf16>, vector<192x128xf32> -> vector<192x128xf32>
    %4 = vector.extract_strided_slice %3 {offsets = [0, 0], sizes = [64, 128], strides = [1, 1]} : vector<192x128xf32> to vector<64x128xf32>
    %5 = vector.extract_strided_slice %1 {offsets = [0, 0], sizes = [64, 1], strides = [1, 1]} : vector<237x1xf32> to vector<64x1xf32>
    %6 = vector.broadcast %5 : vector<64x1xf32> to vector<64x128xf32>
    %7 = arith.addf %4, %6 : vector<64x128xf32>
    %cst_5 = arith.constant 0.000000e+00 : f32
    %8 = vector.broadcast %cst_5 : f32 to vector<64x128xf32>
    %9 = arith.maximumf %7, %8 : vector<64x128xf32>
    %c0_6 = arith.constant 0 : index
    %c0_7 = arith.constant 0 : index
    %10 = vector.load %arg3[%c0_6, %c0_7] : memref<96x64xbf16, #tpu.memory_space<vmem>>, vector<96x64xbf16>
    %11 = arith.truncf %9 : vector<64x128xf32> to vector<64x128xbf16>
    %cst_8 = arith.constant dense<0.000000e+00> : vector<96x128xf32>
    %12 = tpu.matmul %10, %11, %cst_8 {dimension_numbers = #tpu.dot_dimension_numbers<[1], [0], [0], [1], [0, 0, 1, 1], [], []>} : vector<96x64xbf16>, vector<64x128xbf16>, vector<96x128xf32> -> vector<96x128xf32>
    %13 = vector.extract_strided_slice %3 {offsets = [64, 0], sizes = [32, 128], strides = [1, 1]} : vector<192x128xf32> to vector<32x128xf32>
    %14 = vector.extract_strided_slice %12 {offsets = [0, 0], sizes = [32, 128], strides = [1, 1]} : vector<96x128xf32> to vector<32x128xf32>
    %15 = arith.addf %13, %14 : vector<32x128xf32>
    %16 = vector.extract_strided_slice %1 {offsets = [64, 0], sizes = [32, 1], strides = [1, 1]} : vector<237x1xf32> to vector<32x1xf32>
    %17 = vector.broadcast %16 : vector<32x1xf32> to vector<32x128xf32>
    %18 = arith.addf %15, %17 : vector<32x128xf32>
    %19 = arith.negf %18 : vector<32x128xf32>
    %20 = math.exp %19 : vector<32x128xf32>
    %cst_9 = arith.constant 1.000000e+00 : f32
    %21 = vector.broadcast %cst_9 : f32 to vector<32x128xf32>
    %22 = arith.addf %21, %20 : vector<32x128xf32>
    %23 = arith.divf %21, %22 : vector<32x128xf32>
    %24 = vector.extract_strided_slice %3 {offsets = [96, 0], sizes = [32, 128], strides = [1, 1]} : vector<192x128xf32> to vector<32x128xf32>
    %25 = vector.extract_strided_slice %12 {offsets = [32, 0], sizes = [32, 128], strides = [1, 1]} : vector<96x128xf32> to vector<32x128xf32>
    %26 = arith.addf %24, %25 : vector<32x128xf32>
    %27 = vector.extract_strided_slice %1 {offsets = [96, 0], sizes = [32, 1], strides = [1, 1]} : vector<237x1xf32> to vector<32x1xf32>
    %28 = vector.broadcast %27 : vector<32x1xf32> to vector<32x128xf32>
    %29 = arith.addf %26, %28 : vector<32x128xf32>
    %30 = arith.negf %29 : vector<32x128xf32>
    %31 = math.exp %30 : vector<32x128xf32>
    %cst_10 = arith.constant 1.000000e+00 : f32
    %32 = vector.broadcast %cst_10 : f32 to vector<32x128xf32>
    %33 = arith.addf %32, %31 : vector<32x128xf32>
    %34 = arith.divf %32, %33 : vector<32x128xf32>
    %35 = vector.extract_strided_slice %3 {offsets = [160, 0], sizes = [32, 128], strides = [1, 1]} : vector<192x128xf32> to vector<32x128xf32>
    %36 = vector.extract_strided_slice %1 {offsets = [160, 0], sizes = [32, 1], strides = [1, 1]} : vector<237x1xf32> to vector<32x1xf32>
    %37 = vector.broadcast %36 : vector<32x1xf32> to vector<32x128xf32>
    %38 = arith.addf %35, %37 : vector<32x128xf32>
    %39 = vector.extract_strided_slice %3 {offsets = [128, 0], sizes = [32, 128], strides = [1, 1]} : vector<192x128xf32> to vector<32x128xf32>
    %40 = vector.extract_strided_slice %12 {offsets = [64, 0], sizes = [32, 128], strides = [1, 1]} : vector<96x128xf32> to vector<32x128xf32>
    %41 = arith.addf %39, %40 : vector<32x128xf32>
    %42 = vector.extract_strided_slice %1 {offsets = [128, 0], sizes = [32, 1], strides = [1, 1]} : vector<237x1xf32> to vector<32x1xf32>
    %43 = vector.broadcast %42 : vector<32x1xf32> to vector<32x128xf32>
    %44 = arith.addf %41, %43 : vector<32x128xf32>
    %45 = arith.mulf %23, %38 : vector<32x128xf32>
    %46 = arith.addf %44, %45 : vector<32x128xf32>
    %47 = math.tanh %46 : vector<32x128xf32>
    %48 = vector.extract_strided_slice %0 {offsets = [32, 0], sizes = [32, 128], strides = [1, 1]} : vector<64x128xbf16> to vector<32x128xbf16>
    %49 = arith.extf %48 : vector<32x128xbf16> to vector<32x128xf32>
    %cst_11 = arith.constant 1.000000e+00 : f32
    %50 = vector.broadcast %cst_11 : f32 to vector<32x128xf32>
    %51 = arith.subf %50, %34 : vector<32x128xf32>
    %52 = arith.mulf %51, %47 : vector<32x128xf32>
    %53 = arith.mulf %34, %49 : vector<32x128xf32>
    %54 = arith.addf %52, %53 : vector<32x128xf32>
    %c0_12 = arith.constant 0 : index
    %c0_13 = arith.constant 0 : index
    %55 = vector.load %arg8[%c0_12, %c0_13] : memref<32x128xf32, #tpu.memory_space<vmem>>, vector<32x128xf32>
    tpu.vector_store %arg8[%c0_12, %c0_13], %54 {strides = array<i32>} : memref<32x128xf32, #tpu.memory_space<vmem>>, vector<32x128xf32>,
    %56 = vector.extract_strided_slice %1 {offsets = [192, 0], sizes = [32, 1], strides = [1, 1]} : vector<237x1xf32> to vector<32x1xf32>
    %57 = vector.extract_strided_slice %1 {offsets = [224, 0], sizes = [13, 1], strides = [1, 1]} : vector<237x1xf32> to vector<13x1xf32>
    %c0_14 = arith.constant 0 : index
    %c0_15 = arith.constant 0 : index
    %58 = vector.load %arg4[%c0_14, %c0_15] : memref<32x32xbf16, #tpu.memory_space<vmem>>, vector<32x32xbf16>
    %59 = arith.truncf %54 : vector<32x128xf32> to vector<32x128xbf16>
    %cst_16 = arith.constant dense<0.000000e+00> : vector<32x128xf32>
    %60 = tpu.matmul %58, %59, %cst_16 {dimension_numbers = #tpu.dot_dimension_numbers<[1], [0], [0], [1], [0, 0, 1, 1], [], []>} : vector<32x32xbf16>, vector<32x128xbf16>, vector<32x128xf32> -> vector<32x128xf32>
    %61 = vector.broadcast %56 : vector<32x1xf32> to vector<32x128xf32>
    %62 = arith.addf %60, %61 : vector<32x128xf32>
    %cst_17 = arith.constant 5.000000e-01 : f32
    %63 = vector.broadcast %cst_17 : f32 to vector<32x128xf32>
    %64 = arith.mulf %63, %62 : vector<32x128xf32>
    %cst_18 = arith.constant 0.707106769 : f32
    %65 = vector.broadcast %cst_18 : f32 to vector<32x128xf32>
    %66 = arith.mulf %62, %65 : vector<32x128xf32>
    %67 = math.erf %66 : vector<32x128xf32>
    %cst_19 = arith.constant 1.000000e+00 : f32
    %68 = vector.broadcast %cst_19 : f32 to vector<32x128xf32>
    %69 = arith.addf %68, %67 : vector<32x128xf32>
    %70 = arith.mulf %64, %69 : vector<32x128xf32>
    %c0_20 = arith.constant 0 : index
    %c0_21 = arith.constant 0 : index
    %71 = vector.load %arg5[%c0_20, %c0_21] : memref<13x32xbf16, #tpu.memory_space<vmem>>, vector<13x32xbf16>
    %72 = arith.truncf %70 : vector<32x128xf32> to vector<32x128xbf16>
    %cst_22 = arith.constant dense<0.000000e+00> : vector<13x128xf32>
    %73 = tpu.matmul %71, %72, %cst_22 {dimension_numbers = #tpu.dot_dimension_numbers<[1], [0], [0], [1], [0, 0, 1, 1], [], []>} : vector<13x32xbf16>, vector<32x128xbf16>, vector<13x128xf32> -> vector<13x128xf32>
    %74 = vector.broadcast %57 : vector<13x1xf32> to vector<13x128xf32>
    %75 = arith.addf %73, %74 : vector<13x128xf32>
    %c0_23 = arith.constant 0 : index
    %c0_24 = arith.constant 0 : index
    %76 = vector.load %arg7[%c0_23, %c0_24] : memref<13x128xf32, #tpu.memory_space<vmem>>, vector<13x128xf32>
    tpu.vector_store %arg7[%c0_23, %c0_24], %75 {strides = array<i32>} : memref<13x128xf32, #tpu.memory_space<vmem>>, vector<13x128xf32>,
    return
  }
  func.func @transform_0(%arg0: i32) -> (i32, i32) {
    %c0_i32 = arith.constant 0 : i32
    %c0_i32_0 = arith.constant 0 : i32
    return %c0_i32, %arg0 : i32, i32
  }
  func.func @transform_1(%arg0: i32) -> (i32, i32) {
    %c0_i32 = arith.constant 0 : i32
    %c0_i32_0 = arith.constant 0 : i32
    %c0_i32_1 = arith.constant 0 : i32
    return %c0_i32, %c0_i32_0 : i32, i32
  }
  func.func @transform_2(%arg0: i32) -> (i32, i32) {
    %c0_i32 = arith.constant 0 : i32
    %c0_i32_0 = arith.constant 0 : i32
    %c0_i32_1 = arith.constant 0 : i32
    return %c0_i32, %c0_i32_0 : i32, i32
  }
  func.func @transform_3(%arg0: i32) -> (i32, i32) {
    %c0_i32 = arith.constant 0 : i32
    %c0_i32_0 = arith.constant 0 : i32
    %c0_i32_1 = arith.constant 0 : i32
    return %c0_i32, %c0_i32_0 : i32, i32
  }
  func.func @transform_4(%arg0: i32) -> (i32, i32) {
    %c0_i32 = arith.constant 0 : i32
    %c0_i32_0 = arith.constant 0 : i32
    %c0_i32_1 = arith.constant 0 : i32
    return %c0_i32, %c0_i32_0 : i32, i32
  }
  func.func @transform_5(%arg0: i32) -> (i32, i32) {
    %c0_i32 = arith.constant 0 : i32
    %c0_i32_0 = arith.constant 0 : i32
    %c0_i32_1 = arith.constant 0 : i32
    return %c0_i32, %c0_i32_0 : i32, i32
  }
  func.func @transform_6(%arg0: i32) -> (i32, i32) {
    %c0_i32 = arith.constant 0 : i32
    %c0_i32_0 = arith.constant 0 : i32
    return %c0_i32, %arg0 : i32, i32
  }
  func.func @transform_7(%arg0: i32) -> (i32, i32) {
    %c0_i32 = arith.constant 0 : i32
    %c0_i32_0 = arith.constant 0 : i32
    return %c0_i32, %arg0 : i32, i32
  }
}

</mosaic_0001>

<bundles_post_ra>
// kernel: nrnn_agent_forward.1
= control target key start
LH: loop header
LB: loop body
LE: loop exit
PB: predicated region body
PF: predicated region fallthrough
CT: control target
= control target key end

     0   :  { %v1171_v1 = vmov 0   ;;  %vm172_vm0 = vcmask 523264   ;;  %vm767_vm1 = vcmask 261120   ;;  %vm1173_vm2 = vmmov 0   ;;  %s1482_s0 = inlined_call_operand.vmem [shape: bf16[64,128], index: 0, kind: input, shape index: {}]   ;;  %s1483_s1 = inlined_call_operand.vmem [shape: bf16[192,64], index: 1, kind: input, shape index: {}]   ;;  %s1484_s5 = inlined_call_operand.vmem [shape: f32[237,1], index: 5, kind: input, shape index: {}]   ;;  %s1485_s2 = inlined_call_operand.vmem [shape: bf16[96,64], index: 2, kind: input, shape index: {}]   ;;  %s1486_s3 = inlined_call_operand.vmem [shape: bf16[32,32], index: 3, kind: input, shape index: {}]   ;;  %s1487_s7 = inlined_call_operand.vmem [shape: f32[32,128], index: 7, kind: output, shape index: {1}]   ;;  %s1488_s4 = inlined_call_operand.vmem [shape: bf16[13,32], index: 4, kind: input, shape index: {}]   ;;  %s1489_s6 = inlined_call_operand.vmem [shape: f32[13,128], index: 6, kind: output, shape index: {0}]  }
   0x1   :  { %v1096_v0 = vld [vmem:[%s1482_s0] sm:$0xff]   ;;  %1094 = vset.pattern.permute.xlu0 %v1171_v1  ;;  %1095 = vset.pattern.permute.xlu1 %v1171_v1  ;;  %v1097_v2 = vld [vmem:[%s1482_s0 + $0x8] sm:$0xff]   ;;  %v1223_v3 = vld [vmem:[%s1482_s0 + $0x10] sm:$0xff]  }
   0x2   :  { %1003 = vmatprep.subr.bf16.mxu0 %v1096_v0  ;;  %1071 = vmatprep.subr.bf16.mxu1 %v1096_v0  ;;  %v1100_v4 = vld [vmem:[%s1483_s1] sm:$0xff]   ;;  %v1234_v6 = vld [vmem:[%s1482_s0 + $0x18] sm:$0xff]   ;;  %v1102_v7 = vld [vmem:[%s1483_s1 + $0x8] sm:$0xff]  }
   0x3   :  { %1004 = vmatpush3.bf16.msra.mxu0 %v1096_v0  ;;  %1075 = vmatpush3.bf16.msra.mxu1 %v1096_v0  ;;  %v1101_v5 = vld [vmem:[%s1483_s1 + $0x20] sm:$0xff]   ;;  %v1103_v8 = vld [vmem:[%s1483_s1 + $0x28] sm:$0xff]   ;;  %v1104_v10 = vld [vmem:[%s1483_s1 + $0x10] sm:$0xff]  }
   0x4   :  { %1005 = vmatprep.subr.bf16.mxu0 %v1097_v2  ;;  %1072 = vmatprep.subr.bf16.mxu1 %v1097_v2  ;;  %v34_v9 = vld [vmem:[%s1484_s5] sm:$0xff]  ;;  %v1105_v11 = vld [vmem:[%s1483_s1 + $0x30] sm:$0xff]   ;;  %v35_v13 = vld [vmem:[%s1484_s5 + $0x8] sm:$0xff] }
   0x5   :  { %1011 = vmatprep.mubr.msk.bf16.mxu0 %vm172_vm0, %v1100_v4  ;;  %1019 = vmatprep.mubr.msk.bf16.mxu1 %vm172_vm0, %v1101_v5  ;;  %v36_v12 = vld [vmem:[%s1484_s5 + $0x10] sm:$0xff]  ;;  %v37_v14 = vld [vmem:[%s1484_s5 + $0x18] sm:$0xff]  ;;  %v38_v15 = vld [vmem:[%s1484_s5 + $0x20] sm:$0xff] }
   0x6   :  { %340 = vperm.xlu0 %1094, %v34_v9   ;;  %350 = vperm.xlu1 %1095, %v36_v12   ;;  %v39_v16 = vld [vmem:[%s1484_s5 + $0x28] sm:$0xff]  ;;  %v1106_v17 = vld [vmem:[%s1483_s1 + $0x18] sm:$0xff]   ;;  %v1108_v19 = vld [vmem:[%s1483_s1 + $0x40] sm:$0xff]  }
   0x7   :  { %1006 = vmatpush3.bf16.msra.mxu0 %v1097_v2  ;;  %1076 = vmatpush3.bf16.msra.mxu1 %v1097_v2  ;;  %v1107_v18 = vld [vmem:[%s1483_s1 + $0x38] sm:$0xff]   ;;  %v40_v20 = vld [vmem:[%s1484_s5 + $0x30] sm:$0xff]  ;;  %v42_v22 = vld [vmem:[%s1484_s5 + $0x40] sm:$0xff] }
   0x8   :  { %1007 = vmatprep.subr.bf16.mxu0 %v1223_v3  ;;  %1073 = vmatprep.subr.bf16.mxu1 %v1223_v3  ;;  %v41_v21 = vld [vmem:[%s1484_s5 + $0x38] sm:$0xff]  ;;  %v43_v23 = vld [vmem:[%s1484_s5 + $0x48] sm:$0xff]  ;;  %v1110_v25 = vld [vmem:[%s1483_s1 + $0x50] sm:$0xff]  }
   0x9   :  { %v1109_v24 = vld [vmem:[%s1483_s1 + $0x48] sm:$0xff]   ;;  %v44_v26 = vld [vmem:[%s1484_s5 + $0x50] sm:$0xff]  ;;  %v45_v27 = vld [vmem:[%s1484_s5 + $0x58] sm:$0xff] }
   0xa   :  { %345 = vperm.xlu0 %1094, %v35_v13   ;;  %355 = vperm.xlu1 %1095, %v37_v14   ;;  %v46_v28 = vld [vmem:[%s1484_s5 + $0x60] sm:$0xff]  ;;  %v47_v29 = vld [vmem:[%s1484_s5 + $0x68] sm:$0xff]  ;;  %v1111_v30 = vld [vmem:[%s1483_s1 + $0x58] sm:$0xff]  }
   0xb   :  { %1008 = vmatpush3.bf16.msra.mxu0 %v1223_v3  ;;  %1077 = vmatpush3.bf16.msra.mxu1 %v1223_v3  ;;  %v48_v31 = vld [vmem:[%s1484_s5 + $0x70] sm:$0xff]  ;;  %v49_v32 = vld [vmem:[%s1484_s5 + $0x78] sm:$0xff]  ;;  %v54_v33 = vld [vmem:[%s1484_s5 + $0xa0] sm:$0xff] }
   0xc   :  { %1009 = vmatprep.subr.bf16.mxu0 %v1234_v6  ;;  %1074 = vmatprep.subr.bf16.mxu1 %v1234_v6  ;;  %v55_v34 = vld [vmem:[%s1484_s5 + $0xa8] sm:$0xff]  ;;  %v50_v35 = vld [vmem:[%s1484_s5 + $0x80] sm:$0xff]  ;;  %v56_v37 = vld [vmem:[%s1484_s5 + $0xb0] sm:$0xff] }
   0xd   :  { %v51_v36 = vld [vmem:[%s1484_s5 + $0x88] sm:$0xff]  ;;  %v57_v38 = vld [vmem:[%s1484_s5 + $0xb8] sm:$0xff]  ;;  %v52_v39 = vld [vmem:[%s1484_s5 + $0x90] sm:$0xff] }
   0xe   :  { %360 = vperm.xlu0 %1094, %v38_v15   ;;  %365 = vperm.xlu1 %1095, %v39_v16   ;;  %v53_v40 = vld [vmem:[%s1484_s5 + $0x98] sm:$0xff]  ;;  %v58_v41 = vld [vmem:[%s1484_s5 + $0xc0] sm:$0xff]  ;;  %v59_v42 = vld [vmem:[%s1484_s5 + $0xc8] sm:$0xff] }
   0xf   :  { %1010 = vmatpush3.bf16.msra.mxu0 %v1234_v6  ;;  %1078 = vmatpush3.bf16.msra.mxu1 %v1234_v6  ;;  %v60_v43 = vld [vmem:[%s1484_s5 + $0xd0] sm:$0xff]  ;;  %v61_v44 = vld [vmem:[%s1484_s5 + $0xd8] sm:$0xff]  ;;  %v62_v45 = vld [vmem:[%s1484_s5 + $0xe0] sm:$0xff] }
  0x10   :  { %v63_v46 = vld [vmem:[%s1484_s5 + $0xe8] sm:$0x1f]  ;;  %v1112_v47 = vld [vmem:[%s1485_s2] sm:$0xff]  }
  0x12   :  { %1012 = vmatmul.mubr.msk.bf16.vlgmr.msra.gmra.mrb[0].mxu0 %vm172_vm0, %v1102_v7  ;;  %1020 = vmatmul.mubr.msk.bf16.vlgmr.msra.gmra.mrb[0].mxu1 %vm172_vm0, %v1103_v8 }
  0x13   :  { %1015 = vmatprep.mubr.msk.bf16.mxu0 %vm172_vm0, %v1104_v10  ;;  %1023 = vmatprep.mubr.msk.bf16.mxu1 %vm172_vm0, %v1105_v11 }
  0x14   :  { %370 = vperm.xlu0 %1094, %v40_v20   ;;  %375 = vperm.xlu1 %1095, %v41_v21  }
  0x18   :  { %545 = vperm.xlu0 %1094, %v42_v22   ;;  %550 = vperm.xlu1 %1095, %v43_v23  }
  0x1a   :  { %1016 = vmatmul.mubr.msk.bf16.gmra.mrb[4].mxu0 %vm172_vm0, %v1106_v17  ;;  %1024 = vmatmul.mubr.msk.bf16.gmra.mrb[4].mxu1 %vm172_vm0, %v1107_v18 }
  0x1b   :  { %1027 = vmatprep.mubr.msk.bf16.mxu1 %vm172_vm0, %v1108_v19  ;;  %1043 = vmatprep.mubr.msk.bf16.mxu0 %vm172_vm0, %v1112_v47 }
  0x1c   :  { %555 = vperm.xlu0 %1094, %v44_v26   ;;  %560 = vperm.xlu1 %1095, %v45_v27  }
  0x20   :  { %597 = vperm.xlu0 %1094, %v46_v28   ;;  %602 = vperm.xlu1 %1095, %v47_v29  }
  0x22   :  { %1028 = vmatmul.mubr.msk.bf16.gmra.mrb[8].mxu1 %vm172_vm0, %v1109_v24 }
  0x23   :  { %1031 = vmatprep.mubr.msk.bf16.mxu1 %vm172_vm0, %v1110_v25 }
  0x24   :  { %607 = vperm.xlu0 %1094, %v48_v31   ;;  %612 = vperm.xlu1 %1095, %v49_v32  }
  0x28   :  { %645 = vperm.xlu0 %1094, %v54_v33   ;;  %650 = vperm.xlu1 %1095, %v55_v34   ;;  %v1113_v34 = vld [vmem:[%s1485_s2 + $0x8] sm:$0xff]  }
  0x2a   :  { %1032 = vmatmul.mubr.msk.bf16.gmra.mrb[12].mxu1 %vm172_vm0, %v1111_v30 }
  0x2c   :  { %673 = vperm.xlu0 %1094, %v50_v35   ;;  %678 = vperm.xlu1 %1095, %v51_v36   ;;  %v1114_v35 = vld [vmem:[%s1485_s2 + $0x10] sm:$0xff]  }
  0x30   :  { %655 = vperm.xlu0 %1094, %v56_v37   ;;  %660 = vperm.xlu1 %1095, %v57_v38  }
  0x34   :  { %683 = vperm.xlu0 %1094, %v52_v39   ;;  %688 = vperm.xlu1 %1095, %v53_v40   ;;  %v1115_v40 = vld [vmem:[%s1485_s2 + $0x18] sm:$0xff]  }
  0x38   :  { %739 = vperm.xlu0 %1094, %v58_v41   ;;  %744 = vperm.xlu1 %1095, %v59_v42   ;;  %v1116_v41 = vld [vmem:[%s1485_s2 + $0x20] sm:$0xff]   ;;  %v1117_v42 = vld [vmem:[%s1485_s2 + $0x28] sm:$0xff]  }
  0x3c   :  { %749 = vperm.xlu0 %1094, %v60_v43   ;;  %754 = vperm.xlu1 %1095, %v61_v44   ;;  %v1118_v43 = vld [vmem:[%s1486_s3] sm:$0xff]  }
  0x3d   :  { %1059 = vmatprep.mubr.msk.bf16.mxu1 %vm767_vm1, %v1118_v43 }
  0x40   :  { %849 = vperm.xlu0 %1094, %v62_v45   ;;  %854 = vperm.xlu1 %1095, %v63_v46  }
  0x85   :  { %v341_v48 = vpop.permute.xlu0 %340  ;;  %v351_v49 = vpop.permute.xlu1 %350 }
  0x89   :  { %v346_v50 = vpop.permute.xlu0 %345  ;;  %v356_v51 = vpop.permute.xlu1 %355 }
  0x8d   :  { %v361_v52 = vpop.permute.xlu0 %360  ;;  %v366_v53 = vpop.permute.xlu1 %365 }
  0x93   :  { %v371_v8 = vpop.permute.xlu0 %370  ;;  %v376_v9 = vpop.permute.xlu1 %375 }
  0x97   :  { %v546_v44 = vpop.permute.xlu0 %545  ;;  %v551_v45 = vpop.permute.xlu1 %550 }
  0x9b   :  { %v556_v46 = vpop.permute.xlu0 %555  ;;  %v561_v47 = vpop.permute.xlu1 %560 }
  0xe5   :  { %v1013_v54 = vpop.f32.mrb[0].mxu0  ;;  %v1380_v55 = vpop.f32.mrb[0].mxu1 }
  0xe6   :  { %v380_v56 = vadd.f32 %v1013_v54, %v351_v49  ;;  %v243_v57 = vpop.f32.mrb[1].mxu0  ;;  %v1382_v58 = vpop.f32.mrb[1].mxu1 }
  0xe7   :  { %v378_v59 = vadd.f32 %v341_v48, %v243_v57  ;;  %v1014_v60 = vpop.f32.mrb[2].mxu0  ;;  %v1384_v61 = vpop.f32.mrb[2].mxu1 }
  0xe8   :  { %v381_v62 = vadd.f32 %v1014_v60, %v356_v51  ;;  %v246_v63 = vpop.f32.mrb[3].mxu0  ;;  %v1386_v0 = vpop.f32.mrb[3].mxu1  ;;  %v388_v2 = vmax.f32 %v380_v56, 0.0 }
  0xe9   :  { %v379_v1 = vadd.f32 %v346_v50, %v246_v63  ;;  %v386_v5 = vmax.f32 %v378_v59, 0.0  ;;  %v598_v48 = vpop.permute.xlu0 %597 }
  0xea   :  { %v389_v4 = vmax.f32 %v381_v62, 0.0 }
  0xeb   :  { %v387_v7 = vmax.f32 %v379_v1, 0.0 }
  0xec   :  { %v407_v10 = vpack.c.bf16 %v389_v4, %v388_v2 }
  0xed   :  { %v406_v11 = vpack.c.bf16 %v387_v7, %v386_v5  ;;  %v1017_v12 = vpop.f32.mrb[4].mxu0  ;;  %v1388_v13 = vpop.f32.mrb[4].mxu1 }
  0xee   :  { %v384_v14 = vadd.f32 %v1017_v12, %v371_v8  ;;  %v259_v15 = vpop.f32.mrb[5].mxu0  ;;  %v1390_v16 = vpop.f32.mrb[5].mxu1 }
  0xef   :  { %v382_v17 = vadd.f32 %v361_v52, %v259_v15  ;;  %v1018_v18 = vpop.f32.mrb[6].mxu0  ;;  %1035 = vmatprep.subr.bf16.mxu0 %v406_v11  ;;  %v1392_v19 = vpop.f32.mrb[6].mxu1 }
  0xf0   :  { %v385_v20 = vadd.f32 %v1018_v18, %v376_v9  ;;  %v262_v21 = vpop.f32.mrb[7].mxu0  ;;  %1036 = vmatpush3.bf16.msra.mxu0 %v406_v11  ;;  %v1394_v22 = vpop.f32.mrb[7].mxu1  ;;  %v392_v24 = vmax.f32 %v384_v14, 0.0 }
  0xf1   :  { %v383_v23 = vadd.f32 %v366_v53, %v262_v21  ;;  %1037 = vmatprep.subr.bf16.mxu0 %v407_v10  ;;  %v390_v26 = vmax.f32 %v382_v17, 0.0  ;;  %v603_v52 = vpop.permute.xlu1 %602  ;;  %v608_v2 = vpop.permute.xlu0 %607 }
  0xf2   :  { %v393_v25 = vmax.f32 %v385_v20, 0.0 }
  0xf3   :  { %v391_v27 = vmax.f32 %v383_v23, 0.0 }
  0xf4   :  { %v409_v28 = vpack.c.bf16 %v393_v25, %v392_v24  ;;  %1038 = vmatpush3.bf16.msra.mxu0 %v407_v10 }
  0xf5   :  { %v408_v29 = vpack.c.bf16 %v391_v27, %v390_v26  ;;  %v1396_v30 = vpop.f32.mrb[8].mxu1  ;;  %v646_v15 = vpop.permute.xlu0 %645 }
  0xf6   :  { %v1398_v31 = vpop.f32.mrb[9].mxu1 }
  0xf7   :  { %1039 = vmatprep.subr.bf16.mxu0 %v408_v29  ;;  %v1400_v32 = vpop.f32.mrb[10].mxu1 }
  0xf8   :  { %1040 = vmatpush3.bf16.msra.mxu0 %v408_v29  ;;  %v1402_v33 = vpop.f32.mrb[11].mxu1 }
  0xf9   :  { %1041 = vmatprep.subr.bf16.mxu0 %v409_v28 }
  0xfc   :  { %1042 = vmatpush3.bf16.msra.mxu0 %v409_v28 }
  0xfd   :  { %v1410_v36 = vpop.f32.mrb[12].mxu1 }
  0xfe   :  { %v1412_v37 = vpop.f32.mrb[13].mxu1 }
  0xff   :  { %v1414_v38 = vpop.f32.mrb[14].mxu1  ;;  %1044 = vmatmul.mubr.msk.bf16.vlgmr.msra.gmra.mrb[8].mxu0 %vm172_vm0, %v1113_v34  ;;  %v674_v34 = vpop.permute.xlu0 %673 }
 0x100   :  { %v1417_v39 = vpop.f32.mrb[15].mxu1  ;;  %1047 = vmatprep.mubr.msk.bf16.mxu0 %vm172_vm0, %v1114_v35 }
 0x107   :  { %1048 = vmatmul.mubr.msk.bf16.gmra.mrb[12].mxu0 %vm172_vm0, %v1115_v40 }
 0x108   :  { %1051 = vmatprep.mubr.msk.bf16.mxu0 %vm172_vm0, %v1116_v41 }
 0x10f   :  { %1052 = vmatmul.mubr.msk.bf16.gmra.mrb[16].mxu0 %vm172_vm0, %v1117_v42 }
 0x1d2   :  { %v1045_v49 = vpop.f32.mrb[8].mxu0 }
 0x1d3   :  { %v541_v50 = vadd.f32 %v1045_v49, %v1380_v55  ;;  %v492_v51 = vpop.f32.mrb[9].mxu0  ;;  %v613_v55 = vpop.permute.xlu1 %612 }
 0x1d4   :  { %v539_v53 = vadd.f32 %v492_v51, %v1382_v58  ;;  %v1046_v54 = vpop.f32.mrb[10].mxu0  ;;  %v656_v49 = vpop.permute.xlu0 %655 }
 0x1d5   :  { %v565_v56 = vadd.f32 %v556_v46, %v541_v50  ;;  %v542_v57 = vadd.f32 %v1046_v54, %v1384_v61  ;;  %v495_v59 = vpop.f32.mrb[11].mxu0 }
 0x1d6   :  { %v563_v60 = vadd.f32 %v546_v44, %v539_v53  ;;  %v540_v62 = vadd.f32 %v495_v59, %v1386_v0 }
 0x1d7   :  { %v958_v63 = vmul.f32 -1.442695, %v565_v56  ;;  %v566_v1 = vadd.f32 %v561_v47, %v542_v57  ;;  %v651_v23 = vpop.permute.xlu1 %650  ;;  %v665_v57 = vadd.f32 %v1410_v36, %v656_v49 }
 0x1d8   :  { %v956_v4 = vmul.f32 -1.442695, %v563_v60  ;;  %v564_v5 = vadd.f32 %v551_v45, %v540_v62  ;;  %v663_v62 = vadd.f32 %v646_v15, %v1412_v37 }
 0x1d9   :  { %1123 = vpow2.f32 %v958_v63  ;;  %v959_v7 = vmul.f32 -1.442695, %v566_v1 }
 0x1da   :  { %1125 = vpow2.f32 %v956_v4  ;;  %v957_v8 = vmul.f32 -1.442695, %v564_v5  ;;  %v1049_v9 = vpop.f32.mrb[12].mxu0 }
 0x1db   :  { %1127 = vpow2.f32 %v959_v7  ;;  %v593_v58 = vadd.f32 %v1049_v9, %v1388_v13  ;;  %v508_v10 = vpop.f32.mrb[13].mxu0  ;;  %v679_v46 = vpop.permute.xlu1 %678 }
 0x1dc   :  { %1129 = vpow2.f32 %v957_v8  ;;  %v591_v61 = vadd.f32 %v508_v10, %v1390_v16  ;;  %v1050_v11 = vpop.f32.mrb[14].mxu0 }
 0x1dd   :  { %v617_v0 = vadd.f32 %v608_v2, %v593_v58  ;;  %v594_v12 = vadd.f32 %v1050_v11, %v1392_v19  ;;  %v511_v14 = vpop.f32.mrb[15].mxu0 }
 0x1de   :  { %v615_v17 = vadd.f32 %v598_v48, %v591_v61  ;;  %v592_v18 = vadd.f32 %v511_v14, %v1394_v22  ;;  %v707_v14 = vunpack.c.l.bf16 %v1223_v3 }
 0x1df   :  { %v962_v20 = vmul.f32 -1.442695, %v617_v0  ;;  %v618_v21 = vadd.f32 %v613_v55, %v594_v12  ;;  %v664_v55 = vadd.f32 %v651_v23, %v1417_v39  ;;  %v709_v12 = vunpack.c.l.bf16 %v1234_v6 }
 0x1e0   :  { %v960_v24 = vmul.f32 -1.442695, %v615_v17  ;;  %v616_v25 = vadd.f32 %v603_v52, %v592_v18  ;;  %v710_v17 = vunpack.c.h.bf16 %v1234_v6  ;;  %v708_v18 = vunpack.c.h.bf16 %v1223_v3 }
 0x1e1   :  { %1131 = vpow2.f32 %v962_v20  ;;  %v963_v13 = vmul.f32 -1.442695, %v618_v21 }
 0x1e2   :  { %1133 = vpow2.f32 %v960_v24  ;;  %v961_v26 = vmul.f32 -1.442695, %v616_v25  ;;  %v1053_v27 = vpop.f32.mrb[16].mxu0 }
 0x1e3   :  { %v1124_v16 = vpop.eup %1123  ;;  %1135 = vpow2.f32 %v963_v13  ;;  %v669_v28 = vadd.f32 %v1053_v27, %v1396_v30  ;;  %v524_v19 = vpop.f32.mrb[17].mxu0 }
 0x1e4   :  { %v1126_v29 = vpop.eup %1125  ;;  %v581_v35 = vadd.f32 1.0, %v1124_v16  ;;  %1137 = vpow2.f32 %v961_v26  ;;  %v667_v22 = vadd.f32 %v524_v19, %v1398_v31  ;;  %v1054_v40 = vpop.f32.mrb[18].mxu0 }
 0x1e5   :  { %v1128_v41 = vpop.eup %1127  ;;  %v579_v42 = vadd.f32 1.0, %v1126_v29  ;;  %v670_v43 = vadd.f32 %v1054_v40, %v1400_v32  ;;  %v527_v44 = vpop.f32.mrb[19].mxu0 }
 0x1e6   :  { %v1130_v45 = vpop.eup %1129  ;;  %1139 = vrcp.f32 %v581_v35  ;;  %v582_v47 = vadd.f32 1.0, %v1128_v41  ;;  %v668_v48 = vadd.f32 %v527_v44, %v1402_v33  ;;  %v661_v31 = vpop.permute.xlu1 %660  ;;  %v691_v8 = vadd.f32 %v674_v34, %v667_v22 }
 0x1e7   :  { %1141 = vrcp.f32 %v579_v42  ;;  %v580_v30 = vadd.f32 1.0, %v1130_v45  ;;  %v684_v33 = vpop.permute.xlu0 %683  ;;  %v666_v1 = vadd.f32 %v1414_v38, %v661_v31 }
 0x1e8   :  { %1143 = vrcp.f32 %v582_v47  ;;  %v693_v2 = vadd.f32 %v684_v33, %v669_v28  ;;  %v692_v0 = vadd.f32 %v679_v46, %v668_v48  ;;  %v1119_v48 = vld [vmem:[%s1486_s3 + $0x8] sm:$0xff]  }
 0x1e9   :  { %1145 = vrcp.f32 %v580_v30  ;;  %v1172_v30 = vmov 0.0  }
 0x1ea   :  { %v689_v7 = vpop.permute.xlu1 %688 }
 0x1eb   :  { %v1132_v50 = vpop.eup %1131  ;;  %v694_v10 = vadd.f32 %v689_v7, %v670_v43  ;;  %v740_v49 = vpop.permute.xlu0 %739 }
 0x1ec   :  { %v1134_v51 = vpop.eup %1133  ;;  %v633_v52 = vadd.f32 1.0, %v1132_v50 }
 0x1ed   :  { %v1136_v53 = vpop.eup %1135  ;;  %v631_v54 = vadd.f32 1.0, %v1134_v51 }
 0x1ee   :  { %v1138_v56 = vpop.eup %1137  ;;  %1147 = vrcp.f32 %v633_v52  ;;  %v634_v32 = vadd.f32 1.0, %v1136_v53  ;;  %v745_v50 = vpop.permute.xlu1 %744 }
 0x1ef   :  { %1149 = vrcp.f32 %v631_v54  ;;  %v632_v59 = vadd.f32 1.0, %v1138_v56  ;;  %v750_v51 = vpop.permute.xlu0 %749 }
 0x1f0   :  { %v1140_v60 = vpop.eup %1139  ;;  %1151 = vrcp.f32 %v634_v32 }
 0x1f1   :  { %v1142_v63 = vpop.eup %1141  ;;  %1153 = vrcp.f32 %v632_v59  ;;  %v697_v4 = vmul.f32 %v1140_v60, %v665_v57 }
 0x1f2   :  { %v1144_v5 = vpop.eup %1143  ;;  %v695_v9 = vmul.f32 %v1142_v63, %v663_v62  ;;  %v755_v54 = vpop.permute.xlu1 %754 }
 0x1f3   :  { %v1146_v36 = vpop.eup %1145  ;;  %v701_v58 = vadd.f32 %v697_v4, %v693_v2  ;;  %v698_v61 = vmul.f32 %v1144_v5, %v666_v1 }
 0x1f4   :  { %v699_v11 = vadd.f32 %v695_v9, %v691_v8  ;;  %v696_v37 = vmul.f32 %v1146_v36, %v664_v55 }
 0x1f5   :  { %1155 = vtanh.f32 %v701_v58  ;;  %v702_v38 = vadd.f32 %v698_v61, %v694_v10 }
 0x1f6   :  { %1157 = vtanh.f32 %v699_v11  ;;  %v700_v15 = vadd.f32 %v696_v37, %v692_v0 }
 0x1f7   :  { %1159 = vtanh.f32 %v702_v38 }
 0x1f8   :  { %v1148_v39 = vpop.eup %1147  ;;  %1161 = vtanh.f32 %v700_v15 }
 0x1f9   :  { %v1150_v20 = vpop.eup %1149  ;;  %v721_v21 = vmul.f32 %v1148_v39, %v709_v12  ;;  %v713_v27 = vsub.f32 1.0, %v1148_v39  ;;  %v850_v39 = vpop.permute.xlu0 %849 }
 0x1fa   :  { %v1152_v23 = vpop.eup %1151  ;;  %v719_v24 = vmul.f32 %v1150_v20, %v707_v14  ;;  %v711_v28 = vsub.f32 1.0, %v1150_v20 }
 0x1fb   :  { %v1154_v25 = vpop.eup %1153  ;;  %v722_v13 = vmul.f32 %v1152_v23, %v710_v17  ;;  %v714_v29 = vsub.f32 1.0, %v1152_v23  ;;  %v1120_v17 = vld [vmem:[%s1488_s4] sm:$0x7f]   ;;  %v855_v23 = vpop.permute.xlu1 %854 }
 0x1fc   :  { %v720_v26 = vmul.f32 %v1154_v25, %v708_v18  ;;  %v712_v6 = vsub.f32 1.0, %v1154_v25 }
 0x1ff   :  { %v1156_v16 = vpop.eup %1155 }
 0x200   :  { %v1158_v19 = vpop.eup %1157  ;;  %v717_v34 = vmul.f32 %v1156_v16, %v713_v27 }
 0x201   :  { %v1160_v35 = vpop.eup %1159  ;;  %v715_v22 = vmul.f32 %v1158_v19, %v711_v28 }
 0x202   :  { %v1162_v40 = vpop.eup %1161  ;;  %v718_v41 = vmul.f32 %v1160_v35, %v714_v29  ;;  %v725_v3 = vadd.f32 %v721_v21, %v717_v34 }
 0x203   :  { %v716_v42 = vmul.f32 %v1162_v40, %v712_v6  ;;  %v723_v43 = vadd.f32 %v719_v24, %v715_v22 }
 0x204   :  { %v726_v44 = vadd.f32 %v722_v13, %v718_v41  ;;  %729 = vst [vmem:[%s1487_s7 + $0x10] sm:$0xff] %v725_v3 }
 0x205   :  { %v724_v45 = vadd.f32 %v720_v26, %v716_v42  ;;  %727 = vst [vmem:[%s1487_s7] sm:$0xff] %v723_v43 }
 0x206   :  { %730 = vst [vmem:[%s1487_s7 + $0x18] sm:$0xff] %v726_v44  ;;  %v736_v46 = vpack.c.bf16 %v726_v44, %v725_v3 }
 0x207   :  { %728 = vst [vmem:[%s1487_s7 + $0x8] sm:$0xff] %v724_v45  ;;  %v735_v47 = vpack.c.bf16 %v724_v45, %v723_v43 }
 0x209   :  { %1055 = vmatprep.subr.bf16.mxu1 %v735_v47 }
 0x20a   :  { %1056 = vmatpush3.bf16.msra.mxu1 %v735_v47 }
 0x20b   :  { %1057 = vmatprep.subr.bf16.mxu1 %v736_v46 }
 0x20e   :  { %1058 = vmatpush3.bf16.msra.mxu1 %v736_v46 }
 0x20f   :  { %1063 = vmatprep.subr.bf16.mxu1 %v1172_v30 }
 0x211   :  { %1060 = vmatmul.mubr.msk.bf16.vlgmr.msra.gmra.mrb[16].mxu1 %vm767_vm1, %v1119_v48 }
 0x212   :  { %1067 = vmatprep.mubr.msk.bf16.mxu1 %vm1173_vm2, %v1172_v30 }
 0x2e4   :  { %v1061_v31 = vpop.f32.mrb[16].mxu1 }
 0x2e5   :  { %v817_v52 = vadd.f32 %v1061_v31, %v750_v51  ;;  %v808_v53 = vpop.f32.mrb[17].mxu1 }
 0x2e6   :  { %v809_v56 = vadd.f32 %v808_v53, %v740_v49  ;;  %v1062_v32 = vpop.f32.mrb[18].mxu1 }
 0x2e7   :  { %v829_v57 = vmul.f32 0.70710677, %v817_v52  ;;  %v820_v59 = vadd.f32 %v1062_v32, %v755_v54  ;;  %v811_v60 = vpop.f32.mrb[19].mxu1  ;;  %v825_v9 = vmul.f32 0.5, %v817_v52 }
 0x2e8   :  { %v827_v33 = vmul.f32 0.70710677, %v809_v56  ;;  %v812_v62 = vadd.f32 %v811_v60, %v745_v50  ;;  %v823_v10 = vmul.f32 0.5, %v809_v56 }
 0x2e9   :  { %1163 = verf.f32 %v829_v57  ;;  %v830_v63 = vmul.f32 0.70710677, %v820_v59  ;;  %v826_v36 = vmul.f32 0.5, %v820_v59 }
 0x2ea   :  { %1165 = verf.f32 %v827_v33  ;;  %v828_v1 = vmul.f32 0.70710677, %v812_v62  ;;  %v824_v61 = vmul.f32 0.5, %v812_v62 }
 0x2eb   :  { %1167 = verf.f32 %v830_v63 }
 0x2ec   :  { %1169 = verf.f32 %v828_v1 }
 0x2f3   :  { %v1164_v2 = vpop.eup %1163 }
 0x2f4   :  { %v1166_v4 = vpop.eup %1165  ;;  %v837_v5 = vadd.f32 1.0, %v1164_v2 }
 0x2f5   :  { %v1168_v7 = vpop.eup %1167  ;;  %v835_v55 = vadd.f32 1.0, %v1166_v4 }
 0x2f6   :  { %v1170_v8 = vpop.eup %1169  ;;  %v838_v58 = vadd.f32 1.0, %v1168_v7  ;;  %v841_v0 = vmul.f32 %v837_v5, %v825_v9 }
 0x2f7   :  { %v836_v11 = vadd.f32 1.0, %v1170_v8  ;;  %v839_v12 = vmul.f32 %v835_v55, %v823_v10 }
 0x2f8   :  { %v842_v37 = vmul.f32 %v838_v58, %v826_v36 }
 0x2f9   :  { %v840_v38 = vmul.f32 %v836_v11, %v824_v61 }
 0x2fa   :  { %v846_v14 = vpack.c.bf16 %v842_v37, %v841_v0 }
 0x2fb   :  { %v845_v15 = vpack.c.bf16 %v840_v38, %v839_v12 }
 0x2fd   :  { %1064 = vmatpush3.bf16.msra.mxu1 %v845_v15 }
 0x2fe   :  { %1065 = vmatprep.subr.bf16.mxu1 %v1172_v30 }
 0x301   :  { %1066 = vmatpush3.bf16.msra.mxu1 %v846_v14 }
 0x304   :  { %1068 = vmatmul.mubr.msk.bf16.vlgmr.msra.gmra.mrb[20].mxu1 %vm767_vm1, %v1120_v17 }
 0x3d7   :  { %v899_v18 = vpop.f32.mrb[20].mxu1 }
 0x3d8   :  { %v900_v20 = vadd.f32 %v899_v18, %v850_v39  ;;  %v1069_v21 = vpop.f32.mrb[21].mxu1 }
 0x3d9   :  { %v902_v24 = vpop.f32.mrb[22].mxu1 }
 0x3da   :  { %906 = vst [vmem:[%s1489_s6] sm:$0xff] %v900_v20  ;;  %v903_v25 = vadd.f32 %v902_v24, %v855_v23  ;;  %v1070_v13 = vpop.f32.mrb[23].mxu1 }
 0x3dc   :  { %907 = vst [vmem:[%s1489_s6 + $0x8] sm:$0x1f] %v903_v25 }

</bundles_post_ra>
